<compile_context>
chip_gen: v6e
topology: v6e:2x2x1
jax: 0.10.0
libtpu: 0.0.40
codegen_flags: <defaults>
</compile_context>

<pallas_src>
import jax
import jax.numpy as jnp
from jax.experimental import pallas as pl
from jax.experimental.pallas import tpu as pltpu


def bert_pooler_kernel(x_ref, w_ref, b_ref, o_ref):
    # dense: [tm, H] @ [H, H]  (MXU, f32 accumulation), bias broadcast over rows
    h = jnp.dot(x_ref[...], w_ref[...], preferred_element_type=jnp.float32)
    h = h + b_ref[...].astype(jnp.float32)
    # tanh runs on the EUP in f32; cast back to the output dtype at the end
    o_ref[...] = jnp.tanh(h).astype(o_ref.dtype)


def bert_pooler(x, w, b, *, tm=256, use_bf16=False):
    """x: [B, S, H], w: [H, H] (already transposed to in x out), b: [H] -> [B, H]."""
    B, S, H = x.shape
    assert w.shape == (H, H) and b.shape == (H,)

    # First-token pooling (x[:, 0]) — done in the wrapper; it is a tiny slice.
    pooled = x[:, 0, :]                       # [B, H]
    out_dtype = x.dtype

    # Row tiling: tm must be a multiple of 8 (f32 sublane) and no larger than
    # the padded row count. Pad rows so the grid covers M exactly (no asserts
    # on divisibility — review item: cdiv grid / padding instead).
    M = B
    tm = max(8, min(int(tm), pl.cdiv(M, 8) * 8))
    tm = (tm // 8) * 8
    M_pad = pl.cdiv(M, tm) * tm
    if M_pad != M:
        pooled = jnp.pad(pooled, ((0, M_pad - M), (0, 0)))

    # Optional bf16 matmul inputs (halves HBM traffic, fast MXU path); the
    # accumulation and tanh stay in f32 so accuracy is preserved.
    if use_bf16:
        pooled_in = pooled.astype(jnp.bfloat16)
        w_in = w.astype(jnp.bfloat16)
    else:
        pooled_in = pooled
        w_in = w
    b2 = b.reshape(1, H).astype(jnp.float32)

    # VMEM budget: double-buffered x/out tiles + resident weight + bias,
    # with headroom, clamped to 64 MiB so it also fits v7x.
    in_itemsize = jnp.dtype(pooled_in.dtype).itemsize
    out_itemsize = jnp.dtype(out_dtype).itemsize
    vmem_needed = (
        2 * tm * H * in_itemsize        # x tile, double-buffered
        + 2 * H * H * in_itemsize       # weight (resident; counted x2 for safety)
        + 2 * H * 4                     # bias
        + 2 * tm * H * out_itemsize     # output tile, double-buffered
    )
    vmem_limit = int(min(max(2 * vmem_needed, 16 * 2**20), 64 * 2**20))

    out = pl.pallas_call(
        bert_pooler_kernel,
        out_shape=jax.ShapeDtypeStruct((M_pad, H), out_dtype),
        grid=(M_pad // tm,),
        in_specs=[
            pl.BlockSpec((tm, H), lambda i: (i, 0)),   # pooled rows tile
            pl.BlockSpec((H, H), lambda i: (0, 0)),    # full weight (resident)
            pl.BlockSpec((1, H), lambda i: (0, 0)),    # bias
        ],
        out_specs=pl.BlockSpec((tm, H), lambda i: (i, 0)),
        compiler_params=pltpu.CompilerParams(
            dimension_semantics=("parallel",),
            vmem_limit_bytes=vmem_limit,
        ),
    )(pooled_in, w_in, b2)

    return out[:M] if M_pad != M else out


def reference(x, w, b):
    return jnp.tanh(x[:, 0, :] @ w + b)


if __name__ == "__main__":
    # Small config consistent with the module: n_embd = 32 -> Linear(32, 32)
    B, S, H = 2, 8, 32
    key = jax.random.PRNGKey(0)
    k1, k2, k3 = jax.random.split(key, 3)

    x = jax.random.normal(k1, (B, S, H), dtype=jnp.float32)
    # nn.Linear stores weight as [out, in] and computes x @ W.T; here w is
    # already the [in, out] matrix the kernel multiplies by (i.e. W.T).
    w = jax.random.normal(k2, (H, H), dtype=jnp.float32) * 0.02
    b = jax.random.normal(k3, (H,), dtype=jnp.float32) * 0.02

    out = bert_pooler(x, w, b)          # f32 path for tight numerical match
    out = jax.block_until_ready(out)

    ref = reference(x, w, b)
    assert out.shape == (B, H)
    assert jnp.allclose(out, ref, atol=1e-4, rtol=1e-4)
    print("KERNEL_OK")
</pallas_src>

<mosaic_0001>
module attributes {stable_mosaic.version = 11 : i64} {
  func.func @bert_pooler_kernel(%arg0: i32, %arg1: memref<8x32xf32, #tpu.memory_space<vmem>>, %arg2: memref<32x32xf32, #tpu.memory_space<vmem>>, %arg3: memref<1x32xf32, #tpu.memory_space<vmem>>, %arg4: memref<8x32xf32, #tpu.memory_space<vmem>>) attributes {dimension_semantics = [#tpu.dimension_semantics<parallel>], iteration_bounds = array<i64: 1>, scalar_prefetch = 0 : i64, scratch_operands = 0 : i64, tpu.core_type = #tpu.core_type<tc>, window_params = [{transform_indices = @transform_0, window_bounds = array<i64: 8, 32>}, {pipeline_mode = #tpu.pipeline_mode<synchronous>, transform_indices = @transform_1, window_bounds = array<i64: 32, 32>}, {pipeline_mode = #tpu.pipeline_mode<synchronous>, transform_indices = @transform_2, window_bounds = array<i64: 1, 32>}, {transform_indices = @transform_3, window_bounds = array<i64: 8, 32>}]} {
    %c0 = arith.constant 0 : index
    %c0_0 = arith.constant 0 : index
    %0 = vector.load %arg1[%c0, %c0_0] : memref<8x32xf32, #tpu.memory_space<vmem>>, vector<8x32xf32>
    %c0_1 = arith.constant 0 : index
    %c0_2 = arith.constant 0 : index
    %1 = vector.load %arg2[%c0_1, %c0_2] : memref<32x32xf32, #tpu.memory_space<vmem>>, vector<32x32xf32>
    %cst = arith.constant dense<0.000000e+00> : vector<8x32xf32>
    %2 = tpu.matmul %0, %1, %cst {dimension_numbers = #tpu.dot_dimension_numbers<[1], [0], [0], [1], [0, 0, 1, 1], [], []>} : vector<8x32xf32>, vector<32x32xf32>, vector<8x32xf32> -> vector<8x32xf32>
    %c0_3 = arith.constant 0 : index
    %c0_4 = arith.constant 0 : index
    %3 = vector.load %arg3[%c0_3, %c0_4] : memref<1x32xf32, #tpu.memory_space<vmem>>, vector<1x32xf32>
    %4 = vector.broadcast %3 : vector<1x32xf32> to vector<8x32xf32>
    %5 = arith.addf %2, %4 : vector<8x32xf32>
    %6 = math.tanh %5 : vector<8x32xf32>
    %c0_5 = arith.constant 0 : index
    %c0_6 = arith.constant 0 : index
    %7 = vector.load %arg4[%c0_5, %c0_6] : memref<8x32xf32, #tpu.memory_space<vmem>>, vector<8x32xf32>
    tpu.vector_store %arg4[%c0_5, %c0_6], %6 {strides = array<i32>} : memref<8x32xf32, #tpu.memory_space<vmem>>, vector<8x32xf32>,
    return
  }
  func.func @transform_0(%arg0: i32) -> (i32, i32) {
    %c0_i32 = arith.constant 0 : i32
    %c0_i32_0 = arith.constant 0 : i32
    return %arg0, %c0_i32 : i32, i32
  }
  func.func @transform_1(%arg0: i32) -> (i32, i32) {
    %c0_i32 = arith.constant 0 : i32
    %c0_i32_0 = arith.constant 0 : i32
    %c0_i32_1 = arith.constant 0 : i32
    return %c0_i32, %c0_i32_0 : i32, i32
  }
  func.func @transform_2(%arg0: i32) -> (i32, i32) {
    %c0_i32 = arith.constant 0 : i32
    %c0_i32_0 = arith.constant 0 : i32
    %c0_i32_1 = arith.constant 0 : i32
    return %c0_i32, %c0_i32_0 : i32, i32
  }
  func.func @transform_3(%arg0: i32) -> (i32, i32) {
    %c0_i32 = arith.constant 0 : i32
    %c0_i32_0 = arith.constant 0 : i32
    return %arg0, %c0_i32 : i32, i32
  }
}

</mosaic_0001>

<bundles_post_ra>
// kernel: tpu_custom_call.1
= control target key start
LH: loop header
LB: loop body
LE: loop exit
PB: predicated region body
PF: predicated region fallthrough
CT: control target
= control target key end

     0   :  { %8 = vsyncpa [#allocation3], 0  ;;  %s277_s0 = inlined_call_operand.hbm [shape: f32[8,32], index: 0, kind: input, shape index: {}]   ;;  %s278_s1 = inlined_call_operand.hbm [shape: f32[32,32], index: 1, kind: input, shape index: {}]   ;;  %s279_s2 = inlined_call_operand.vmem [shape: f32[1,32], index: 2, kind: input, shape index: {}]   ;;  %s280_s3 = inlined_call_operand.hbm [shape: f32[8,32], index: 3, kind: output, shape index: {}]  }
   0x1   :  { %9 = vsyncpa [#allocation6], 0 }
   0x2   :  { %10 = vsyncpa [#allocation4], 0  ;;  %s238_s12 = smov [#allocation2]   ;;  %s239_s14 = smov [#allocation5]  }
   0x3   :  { %s17_s13 = sshll.u32 %s238_s12, 4  ;;  %s26_s15 = sshll.u32 %s239_s14, 4  ;;  %s18_s13 = int_to_ptr.vmem [resolvable:$true] %s17_s13  ;;  %s27_s15 = int_to_ptr.vmem [resolvable:$true] %s26_s15 }
   0x4   :  { %s180_s16 = scalar_lea.vmem %s18_s13, 128  ;;  %p185_p1 = scmp.lt.s32.totalorder %s18_s13, %s18_s13 }
   0x5   :  { %p181_p0 = scmp.ne.s32.totalorder %s18_s13, %s180_s16  ;;  %p186_p2 = scmp.lt.s32.totalorder %s180_s16, %s180_s16 }
   0x7   :  { %p187_p3 = por %p186_p2, %p185_p1 }
   0x9   :  { %p188_p4 = pnand %p187_p3, %p181_p0 }
   0xb   :  { %191 = shalt.err (!%p188_p4)
}
   0xc   :  { %20 = dma.hbm_to_vmem [thread:$0]  %s277_s0, 128, %s18_s13, [#allocation3]  }
   0xd   :  { %s200_s19 = scalar_lea.vmem %s27_s15, 512  ;;  %p205_p6 = scmp.lt.s32.totalorder %s27_s15, %s27_s15 }
   0xe   :  { %p201_p5 = scmp.ne.s32.totalorder %s27_s15, %s200_s19  ;;  %p206_p7 = scmp.lt.s32.totalorder %s200_s19, %s200_s19 }
  0x10   :  { %p207_p8 = por %p206_p7, %p205_p6 }
  0x12   :  { %p208_p9 = pnand %p207_p8, %p201_p5 }
  0x14   :  { %211 = shalt.err (!%p208_p9)
}
  0x15   :  { %s240_s20 = smov 128   ;;  %s241_s21 = smov 8  }
  0x16   :  { %32 = dma.hbm_to_vmem [thread:$0]  %s278_s1, 512, %s27_s15, [#allocation6], %s240_s20, %s240_s20, %s241_s21  }
  0x17   :  { %232 = dma.done.wait [#allocation3], 128  }
  0x18   :  { %233 = vsyncadd [#allocation3], 4294967168 }
  0x19   :  { %234 = dma.done.wait [#allocation6], 512  }
  0x1a   :  { %235 = vsyncadd [#allocation6], 4294966784  ;;  %v242_v0 = vmov 0.0   ;;  %vm243_vm0 = vmmov 0   ;;  %v45_v1 = vld [vmem:[#allocation5 + $0x18] sm:$0xff]  ;;  %v44_v2 = vld [vmem:[#allocation5 + $0x10] sm:$0xff] }
  0x1b   :  { %152 = vmatprep.subr.mxu0 %v242_v0  ;;  %160 = vmatprep.mubr.msk.f32.mxu0 %vm243_vm0, %v242_v0  ;;  %v43_v3 = vld [vmem:[#allocation5 + $0x8] sm:$0xff]  ;;  %v42_v4 = vld [vmem:[#allocation5] sm:$0xff]  ;;  %v41_v5 = vld [vmem:[#allocation2] sm:$0xff]  ;;  %vm53_vm1 = vcmask 261120   ;;  %s244_s24 = smov [#allocation7]  }
  0x1c   :  { %153 = vmatpush3.msra.mxu0 %v45_v1  ;;  %v145_v6 = vld [vmem:[%s279_s2] ss:$0 sm:$0xff]  ;;  %s135_s25 = sshll.u32 %s244_s24, 4  ;;  %s136_s25 = int_to_ptr.vmem [resolvable:$true] %s135_s25 }
  0x1d   :  { %154 = vmatprep.subr.mxu0 %v242_v0  ;;  %s212_s26 = scalar_lea.vmem %s136_s25, 128  ;;  %p217_p11 = scmp.lt.s32.totalorder %s136_s25, %s136_s25 }
  0x1e   :  { %155 = vmatpush3.msra.mxu0 %v44_v2  ;;  %p213_p10 = scmp.ne.s32.totalorder %s136_s25, %s212_s26  ;;  %p218_p12 = scmp.lt.s32.totalorder %s212_s26, %s212_s26 }
  0x1f   :  { %156 = vmatprep.subr.mxu0 %v242_v0 }
  0x20   :  { %157 = vmatpush3.msra.mxu0 %v43_v3  ;;  %p219_p13 = por %p218_p12, %p217_p11 }
  0x21   :  { %158 = vmatprep.subr.mxu0 %v242_v0 }
  0x22   :  { %159 = vmatpush3.msra.mxu0 %v42_v4  ;;  %p220_p0 = pnand %p219_p13, %p213_p10 }
  0x23   :  { %161 = vmatmul.mubr.msk.f32.vlgmr.msra.gmra.mxu0 %vm53_vm1, %v41_v5 }
  0xe3   :  { %v123_v7 = vpop.f32.mrf.mxu0 }
  0xe4   :  { %v124_v8 = vadd.f32 %v145_v6, %v123_v7 }
  0xe5   :  { %v162_v9 = vpop.f32.mrf.mxu0 }
  0xe6   :  { %170 = vtanh.f32 %v124_v8 }
  0xf3   :  { %v171_v10 = vpop.eup %170 }
  0xf4   :  { %128 = vst.msk [vmem:[#allocation7] sm:$0xff] %vm53_vm1, %v171_v10 }
  0xf5   :  { %223 = shalt.err (!%p220_p0)
}
  0xf6   :  { %138 = dma.vmem_to_hbm [thread:$0]  %s136_s25, 128, %s280_s3, [#allocation4]  }
  0xf7   :  { %236 = dma.done.wait [#allocation4], 128  }
  0xf8   :  { %237 = vsyncadd [#allocation4], 4294967168 }
  0xf9   :  { %142 = vsyncpa [#allocation3], 1 }
  0xfa   :  { %143 = vsyncpa [#allocation6], 1 }
  0xfb   :  { %144 = vsyncpa [#allocation4], 1 }

</bundles_post_ra>
